<compile_context>
chip_gen: v6e
topology: v6e:2x2x1
jax: 0.10.0
libtpu: 0.0.40
codegen_flags: <defaults>
</compile_context>

<pallas_src>
import jax
import jax.numpy as jnp
from jax.experimental import pallas as pl
from jax.experimental.pallas import tpu as pltpu

LANES = 128      # lane width: classifier columns padded to this
SUBLANES = 8     # sublane granularity for batch tiles
NEG_BIG = -1e30  # bias for padded label columns -> exp() == 0 in softmax


def _round_up(x, m):
    return (x + m - 1) // m * m


def _vmem_capacity_bytes():
    """Per-core VMEM capacity; conservative fallback if query is unavailable."""
    try:
        cap = int(pltpu.get_tpu_info().vmem_capacity_bytes)
        if cap > 0:
            return cap
    except Exception:
        pass
    return 64 * 2**20   # v7x per-TensorCore VMEM (smallest of v5e/v6e/v7x)


def _select_tiles(B, S, H, vmem_cap):
    """Pick (TB, TS, S_pad): big HBM blocks, minimal padding, VMEM-safe."""
    # Sequence tiling: no padding for moderate S; 256-wide reduction otherwise.
    if S <= 1024:
        TS, S_pad = S, S
    else:
        TS = 256
        S_pad = _round_up(S, TS)

    # Batch tiling: target multi-MiB h blocks, capped so the double-buffered
    # h + mask blocks stay within ~35% of VMEM (weights/output/accs need room).
    per_row_bytes = TS * H * 2 + TS * 2            # bf16 h row + bf16 mask row
    budget = int(0.35 * vmem_cap)
    tb_cap = max(SUBLANES, budget // (2 * per_row_bytes))
    TB = min(256, (tb_cap // SUBLANES) * SUBLANES)

    if B <= SUBLANES:
        TB = B                                      # single tile == full batch
    else:
        TB = max(SUBLANES, min(TB, _round_up(B, SUBLANES)))
        if B >= 2 * SUBLANES:
            # keep >= 2 batch tiles so the leading "parallel" axis can shard
            # across both TensorCores on v7x (no cost on v5e/v6e).
            half = (_round_up(B, 2 * SUBLANES) // 2 // SUBLANES) * SUBLANES
            TB = max(SUBLANES, min(TB, half))
    return TB, TS, S_pad


def classifier_softmax_kernel(h_ref, mask_ref, w_ref, b_ref, out_ref,
                              pool_acc, den_acc):
    """Grid = (batch_tiles [parallel], seq_tiles [arbitrary reduction]).

    Each seq step accumulates masked-sum pooling (VPU multiply + sublane
    reduce) and mask counts in f32; the last seq step does mean -> classifier
    matmul (MXU) -> softmax, all in f32, with exact division in finalize.
    """
    s = pl.program_id(1)

    @pl.when(s == 0)
    def _init():
        pool_acc[...] = jnp.zeros_like(pool_acc)
        den_acc[...] = jnp.zeros_like(den_acc)

    h = h_ref[...].astype(jnp.float32)       # (TB, TS, H)
    m = mask_ref[...].astype(jnp.float32)    # (TB, TS)

    # Masked-sum pooling: VPU mask-multiply + sum over the sequence (sublane)
    # axis.  Keeps the MXU out of the per-step hot path (it would only get
    # M=1 work here), so the steady state stays DMA-bound.
    pool_acc[...] += jnp.sum(h * m[:, :, None], axis=1)          # (TB, H)
    den_acc[...] += jnp.sum(m, axis=1, keepdims=True)            # (TB, 1)

    @pl.when(s == pl.num_programs(1) - 1)
    def _finalize():
        denom = jnp.maximum(den_acc[...], 1.0)      # guard all-zero mask rows
        pooled = pool_acc[...] / denom              # exact div: off hot path

        logits = jnp.dot(pooled, w_ref[...],
                         preferred_element_type=jnp.float32) + b_ref[...]

        # numerically-stable softmax over the lane-padded label axis; padded
        # columns carry zero weights and a -1e30 bias, so exp() == 0 there.
        mx = jnp.max(logits, axis=-1, keepdims=True)
        e = jnp.exp(logits - mx)
        out_ref[...] = (e / jnp.sum(e, axis=-1, keepdims=True)).astype(
            out_ref.dtype)


def softmax_module_forward(input_ids, attention_mask, token_type_ids, params):
    """Glue (embedding lookup, minimal padding) in JAX; hot path in Pallas."""
    word_emb = params["word_emb"]      # (V, H) f32
    type_emb = params["type_emb"]      # (T, H) f32
    cls_w = params["cls_w"]            # (H, C) f32
    cls_b = params["cls_b"]            # (1, C) f32

    # embedding lookup (glue); stream activations as bf16 to halve HBM traffic
    h = (word_emb[input_ids] + type_emb[token_type_ids]).astype(jnp.bfloat16)
    mask = attention_mask.astype(jnp.bfloat16)

    B, S, H = h.shape
    C = cls_w.shape[1]
    C_pad = _round_up(max(C, LANES), LANES)        # lane-dense output

    vmem_cap = _vmem_capacity_bytes()
    TB, TS, S_pad = _select_tiles(B, S, H, vmem_cap)

    # Only the sequence axis ever needs real padding (zero mask positions must
    # be backed by finite data).  Trailing partial *batch* blocks are fine:
    # each output row depends only on its own input row, and tail rows are
    # sliced off below.  For S <= 1024 this path copies nothing.
    if S_pad != S:
        h = jnp.pad(h, ((0, 0), (0, S_pad - S), (0, 0)))
        mask = jnp.pad(mask, ((0, 0), (0, S_pad - S)))

    # classifier weights: padded columns are exactly zero, padded bias -1e30
    w_p = jnp.zeros((H, C_pad), jnp.float32).at[:, :C].set(cls_w)
    b_p = jnp.full((1, C_pad), NEG_BIG, jnp.float32).at[:, :C].set(cls_b)

    grid = (pl.cdiv(B, TB), S_pad // TS)

    # VMEM budget: double-buffered streamed blocks + weights + output + accs,
    # limit derived from this chip generation's capacity (v7x 64 MiB safe,
    # v5e/v6e allowed to go well past the old 48 MiB clamp).
    blk_bytes = (2 * TB * TS * (H * 2 + 2)            # h + mask (bf16, 2 bufs)
                 + 2 * (H * C_pad * 4 + C_pad * 4)    # weights + bias (f32)
                 + 2 * TB * C_pad * 4                 # output block
                 + TB * (H + 1) * 4)                  # f32 accumulators
    vmem_limit = int(min(max(2 * blk_bytes, 16 * 2**20), int(0.80 * vmem_cap)))
    vmem_limit = max(vmem_limit, blk_bytes + (4 << 20))

    out_p = pl.pallas_call(
        classifier_softmax_kernel,
        out_shape=jax.ShapeDtypeStruct((B, C_pad), jnp.float32),
        grid_spec=pltpu.PrefetchScalarGridSpec(
            num_scalar_prefetch=0,
            grid=grid,
            in_specs=[
                pl.BlockSpec((TB, TS, H), lambda b, s: (b, s, 0)),
                pl.BlockSpec((TB, TS), lambda b, s: (b, s)),
                pl.BlockSpec((H, C_pad), lambda b, s: (0, 0)),
                pl.BlockSpec((1, C_pad), lambda b, s: (0, 0)),
            ],
            out_specs=pl.BlockSpec((TB, C_pad), lambda b, s: (b, 0)),
            scratch_shapes=[
                pltpu.VMEM((TB, H), jnp.float32),   # pooled-sum accumulator
                pltpu.VMEM((TB, 1), jnp.float32),   # mask-count accumulator
            ],
        ),
        compiler_params=pltpu.CompilerParams(
            dimension_semantics=("parallel", "arbitrary"),
            vmem_limit_bytes=vmem_limit,
        ),
    )(h, mask, w_p, b_p)

    return out_p[:, :C]


def reference_forward(input_ids, attention_mask, token_type_ids, params):
    """Pure-JAX f32 reference for the same synthetic classifier."""
    h = params["word_emb"][input_ids] + params["type_emb"][token_type_ids]
    m = attention_mask.astype(jnp.float32)
    denom = jnp.maximum(jnp.sum(m, axis=1, keepdims=True), 1.0)
    pooled = jnp.einsum('bsh,bs->bh', h, m) / denom
    logits = pooled @ params["cls_w"] + params["cls_b"]
    return jax.nn.softmax(logits, axis=-1)


def init_params(key, vocab_size=64, type_vocab_size=2, hidden=32, num_labels=4):
    k1, k2, k3, k4 = jax.random.split(key, 4)
    return {
        "word_emb": jax.random.normal(k1, (vocab_size, hidden), jnp.float32) * 0.02,
        "type_emb": jax.random.normal(k2, (type_vocab_size, hidden), jnp.float32) * 0.02,
        "cls_w": jax.random.normal(k3, (hidden, num_labels), jnp.float32) * 0.1,
        "cls_b": jax.random.normal(k4, (1, num_labels), jnp.float32) * 0.1,
    }


if __name__ == "__main__":
    key = jax.random.PRNGKey(0)
    kp, ki, kt = jax.random.split(key, 3)

    B, S = 2, 8
    VOCAB, TYPES, H, C = 64, 2, 32, 4

    params = init_params(kp, VOCAB, TYPES, H, C)

    input_ids = jax.random.randint(ki, (B, S), 0, VOCAB, dtype=jnp.int32)
    token_type_ids = jax.random.randint(kt, (B, S), 0, TYPES, dtype=jnp.int32)
    # mask out the last two tokens of the second example
    attention_mask = jnp.array(
        [[1] * S, [1] * (S - 2) + [0] * 2], dtype=jnp.int32
    )

    scores = softmax_module_forward(input_ids, attention_mask, token_type_ids, params)
    scores = jax.block_until_ready(scores)

    # sanity: shape, exact-ish softmax row sums (exact division in finalize),
    # agreement with the f32 reference (bf16 activation streaming tolerance).
    assert scores.shape == (B, C)
    row_sums = jnp.sum(scores, axis=-1)
    assert bool(jnp.all(jnp.abs(row_sums - 1.0) < 1e-3)), row_sums

    ref = reference_forward(input_ids, attention_mask, token_type_ids, params)
    assert bool(jnp.all(jnp.abs(scores - ref) < 2e-2)), (scores, ref)

    print("KERNEL_OK")
</pallas_src>

<mosaic_0001>
module attributes {stable_mosaic.version = 11 : i64} {
  func.func @classifier_softmax_kernel(%arg0: i32, %arg1: i32, %arg2: memref<2x8x32xbf16, #tpu.memory_space<vmem>>, %arg3: memref<2x8xbf16, #tpu.memory_space<vmem>>, %arg4: memref<32x128xf32, #tpu.memory_space<vmem>>, %arg5: memref<1x128xf32, #tpu.memory_space<vmem>>, %arg6: memref<2x128xf32, #tpu.memory_space<vmem>>, %arg7: memref<2x32xf32, #tpu.memory_space<vmem>>, %arg8: memref<2x1xf32, #tpu.memory_space<vmem>>) attributes {dimension_semantics = [#tpu.dimension_semantics<parallel>, #tpu.dimension_semantics<arbitrary>], iteration_bounds = array<i64: 1, 1>, scalar_prefetch = 0 : i64, scratch_operands = 2 : i64, tpu.core_type = #tpu.core_type<tc>, window_params = [{transform_indices = @transform_0, window_bounds = array<i64: 2, 8, 32>}, {transform_indices = @transform_1, window_bounds = array<i64: 2, 8>}, {pipeline_mode = #tpu.pipeline_mode<synchronous>, transform_indices = @transform_2, window_bounds = array<i64: 32, 128>}, {pipeline_mode = #tpu.pipeline_mode<synchronous>, transform_indices = @transform_3, window_bounds = array<i64: 1, 128>}, {transform_indices = @transform_4, window_bounds = array<i64: 2, 128>}]} {
    %c0_i32 = arith.constant 0 : i32
    %0 = arith.cmpi eq, %arg1, %c0_i32 : i32
    %1 = arith.extui %0 : i1 to i32
    %c0_i32_0 = arith.constant 0 : i32
    %2 = arith.cmpi ne, %1, %c0_i32_0 : i32
    scf.if %2 {
      %cst_16 = arith.constant 0.000000e+00 : f32
      %22 = vector.broadcast %cst_16 : f32 to vector<2x32xf32>
      %c0_17 = arith.constant 0 : index
      %c0_18 = arith.constant 0 : index
      %23 = vector.load %arg7[%c0_17, %c0_18] : memref<2x32xf32, #tpu.memory_space<vmem>>, vector<2x32xf32>
      tpu.vector_store %arg7[%c0_17, %c0_18], %22 {strides = array<i32>} : memref<2x32xf32, #tpu.memory_space<vmem>>, vector<2x32xf32>,
      %cst_19 = arith.constant 0.000000e+00 : f32
      %24 = vector.broadcast %cst_19 : f32 to vector<2x1xf32>
      %c0_20 = arith.constant 0 : index
      %c0_21 = arith.constant 0 : index
      %25 = vector.load %arg8[%c0_20, %c0_21] : memref<2x1xf32, #tpu.memory_space<vmem>>, vector<2x1xf32>
      tpu.vector_store %arg8[%c0_20, %c0_21], %24 {strides = array<i32>} : memref<2x1xf32, #tpu.memory_space<vmem>>, vector<2x1xf32>,
    } else {
    }
    %c0 = arith.constant 0 : index
    %c0_1 = arith.constant 0 : index
    %c0_2 = arith.constant 0 : index
    %3 = vector.load %arg2[%c0, %c0_1, %c0_2] : memref<2x8x32xbf16, #tpu.memory_space<vmem>>, vector<2x8x32xbf16>
    %4 = arith.extf %3 : vector<2x8x32xbf16> to vector<2x8x32xf32>
    %c0_3 = arith.constant 0 : index
    %c0_4 = arith.constant 0 : index
    %5 = vector.load %arg3[%c0_3, %c0_4] : memref<2x8xbf16, #tpu.memory_space<vmem>>, vector<2x8xbf16>
    %6 = arith.extf %5 : vector<2x8xbf16> to vector<2x8xf32>
    %c0_5 = arith.constant 0 : index
    %c0_6 = arith.constant 0 : index
    %7 = vector.load %arg7[%c0_5, %c0_6] : memref<2x32xf32, #tpu.memory_space<vmem>>, vector<2x32xf32>
    %8 = vector.shape_cast %6 : vector<2x8xf32> to vector<2x8x1xf32>
    %9 = vector.broadcast %8 : vector<2x8x1xf32> to vector<2x8x32xf32>
    %10 = arith.mulf %4, %9 : vector<2x8x32xf32>
    %cst = arith.constant dense<0.000000e+00> : vector<2x32xf32>
    %11 = vector.multi_reduction <add>, %10, %cst [1] : vector<2x8x32xf32> to vector<2x32xf32>
    %12 = arith.addf %7, %11 : vector<2x32xf32>
    %c0_7 = arith.constant 0 : index
    %c0_8 = arith.constant 0 : index
    %13 = vector.load %arg7[%c0_7, %c0_8] : memref<2x32xf32, #tpu.memory_space<vmem>>, vector<2x32xf32>
    tpu.vector_store %arg7[%c0_7, %c0_8], %12 {strides = array<i32>} : memref<2x32xf32, #tpu.memory_space<vmem>>, vector<2x32xf32>,
    %c0_9 = arith.constant 0 : index
    %c0_10 = arith.constant 0 : index
    %14 = vector.load %arg8[%c0_9, %c0_10] : memref<2x1xf32, #tpu.memory_space<vmem>>, vector<2x1xf32>
    %cst_11 = arith.constant dense<0.000000e+00> : vector<2xf32>
    %15 = vector.multi_reduction <add>, %6, %cst_11 [1] : vector<2x8xf32> to vector<2xf32>
    %16 = vector.shape_cast %15 : vector<2xf32> to vector<2x1xf32>
    %17 = arith.addf %14, %16 : vector<2x1xf32>
    %c0_12 = arith.constant 0 : index
    %c0_13 = arith.constant 0 : index
    %18 = vector.load %arg8[%c0_12, %c0_13] : memref<2x1xf32, #tpu.memory_space<vmem>>, vector<2x1xf32>
    tpu.vector_store %arg8[%c0_12, %c0_13], %17 {strides = array<i32>} : memref<2x1xf32, #tpu.memory_space<vmem>>, vector<2x1xf32>,
    %c0_i32_14 = arith.constant 0 : i32
    %19 = arith.cmpi eq, %arg1, %c0_i32_14 : i32
    %20 = arith.extui %19 : i1 to i32
    %c0_i32_15 = arith.constant 0 : i32
    %21 = arith.cmpi ne, %20, %c0_i32_15 : i32
    scf.if %21 {
      %c0_16 = arith.constant 0 : index
      %c0_17 = arith.constant 0 : index
      %22 = vector.load %arg8[%c0_16, %c0_17] : memref<2x1xf32, #tpu.memory_space<vmem>>, vector<2x1xf32>
      %cst_18 = arith.constant 1.000000e+00 : f32
      %23 = vector.broadcast %cst_18 : f32 to vector<2x1xf32>
      %24 = arith.maximumf %22, %23 : vector<2x1xf32>
      %c0_19 = arith.constant 0 : index
      %c0_20 = arith.constant 0 : index
      %25 = vector.load %arg7[%c0_19, %c0_20] : memref<2x32xf32, #tpu.memory_space<vmem>>, vector<2x32xf32>
      %26 = vector.broadcast %24 : vector<2x1xf32> to vector<2x32xf32>
      %27 = arith.divf %25, %26 : vector<2x32xf32>
      %c0_21 = arith.constant 0 : index
      %c0_22 = arith.constant 0 : index
      %28 = vector.load %arg4[%c0_21, %c0_22] : memref<32x128xf32, #tpu.memory_space<vmem>>, vector<32x128xf32>
      %cst_23 = arith.constant dense<0.000000e+00> : vector<2x128xf32>
      %29 = tpu.matmul %27, %28, %cst_23 {dimension_numbers = #tpu.dot_dimension_numbers<[1], [0], [0], [1], [0, 0, 1, 1], [], []>} : vector<2x32xf32>, vector<32x128xf32>, vector<2x128xf32> -> vector<2x128xf32>
      %c0_24 = arith.constant 0 : index
      %c0_25 = arith.constant 0 : index
      %30 = vector.load %arg5[%c0_24, %c0_25] : memref<1x128xf32, #tpu.memory_space<vmem>>, vector<1x128xf32>
      %31 = vector.broadcast %30 : vector<1x128xf32> to vector<2x128xf32>
      %32 = arith.addf %29, %31 : vector<2x128xf32>
      %cst_26 = arith.constant dense<0xFF800000> : vector<2xf32>
      %33 = vector.multi_reduction <maximumf>, %32, %cst_26 [1] : vector<2x128xf32> to vector<2xf32>
      %34 = vector.shape_cast %33 : vector<2xf32> to vector<2x1xf32>
      %35 = vector.broadcast %34 : vector<2x1xf32> to vector<2x128xf32>
      %36 = arith.subf %32, %35 : vector<2x128xf32>
      %37 = math.exp %36 : vector<2x128xf32>
      %cst_27 = arith.constant dense<0.000000e+00> : vector<2xf32>
      %38 = vector.multi_reduction <add>, %37, %cst_27 [1] : vector<2x128xf32> to vector<2xf32>
      %39 = vector.shape_cast %38 : vector<2xf32> to vector<2x1xf32>
      %40 = vector.broadcast %39 : vector<2x1xf32> to vector<2x128xf32>
      %41 = arith.divf %37, %40 : vector<2x128xf32>
      %c0_28 = arith.constant 0 : index
      %c0_29 = arith.constant 0 : index
      %42 = vector.load %arg6[%c0_28, %c0_29] : memref<2x128xf32, #tpu.memory_space<vmem>>, vector<2x128xf32>
      tpu.vector_store %arg6[%c0_28, %c0_29], %41 {strides = array<i32>} : memref<2x128xf32, #tpu.memory_space<vmem>>, vector<2x128xf32>,
    } else {
    }
    return
  }
  func.func @transform_0(%arg0: i32, %arg1: i32) -> (i32, i32, i32) {
    %c0_i32 = arith.constant 0 : i32
    %c0_i32_0 = arith.constant 0 : i32
    return %arg0, %arg1, %c0_i32 : i32, i32, i32
  }
  func.func @transform_1(%arg0: i32, %arg1: i32) -> (i32, i32) {
    %c0_i32 = arith.constant 0 : i32
    return %arg0, %arg1 : i32, i32
  }
  func.func @transform_2(%arg0: i32, %arg1: i32) -> (i32, i32) {
    %c0_i32 = arith.constant 0 : i32
    %c0_i32_0 = arith.constant 0 : i32
    %c0_i32_1 = arith.constant 0 : i32
    return %c0_i32, %c0_i32_0 : i32, i32
  }
  func.func @transform_3(%arg0: i32, %arg1: i32) -> (i32, i32) {
    %c0_i32 = arith.constant 0 : i32
    %c0_i32_0 = arith.constant 0 : i32
    %c0_i32_1 = arith.constant 0 : i32
    return %c0_i32, %c0_i32_0 : i32, i32
  }
  func.func @transform_4(%arg0: i32, %arg1: i32) -> (i32, i32) {
    %c0_i32 = arith.constant 0 : i32
    %c0_i32_0 = arith.constant 0 : i32
    return %arg0, %c0_i32 : i32, i32
  }
}

</mosaic_0001>

<bundles_post_ra>
// kernel: tpu_custom_call.1
= control target key start
LH: loop header
LB: loop body
LE: loop exit
PB: predicated region body
PF: predicated region fallthrough
CT: control target
= control target key end

     0   :  { %9 = vsyncpa [#allocation5], 0  ;;  %s397_s0 = inlined_call_operand.hbm [shape: bf16[2,8,32], index: 0, kind: input, shape index: {}]   ;;  %s398_s1 = inlined_call_operand.vmem [shape: bf16[2,8], index: 1, kind: input, shape index: {}]   ;;  %s399_s2 = inlined_call_operand.hbm [shape: f32[32,128], index: 2, kind: input, shape index: {}]   ;;  %s400_s3 = inlined_call_operand.vmem [shape: f32[1,128], index: 3, kind: input, shape index: {}]   ;;  %s401_s4 = inlined_call_operand.hbm [shape: f32[2,128], index: 4, kind: output, shape index: {}]  }
   0x1   :  { %10 = vsyncpa [#allocation8], 0 }
   0x2   :  { %11 = vsyncpa [#allocation6], 0  ;;  %s340_s15 = smov [#allocation4]  }
   0x3   :  { %s17_s16 = sshll.u32 %s340_s15, 4  ;;  %s18_s16 = int_to_ptr.vmem [resolvable:$true] %s17_s16 }
   0x4   :  { %s282_s17 = scalar_lea.vmem %s18_s16, 128  ;;  %p287_p1 = scmp.lt.s32.totalorder %s18_s16, %s18_s16 }
   0x5   :  { %p283_p0 = scmp.ne.s32.totalorder %s18_s16, %s282_s17  ;;  %p288_p2 = scmp.lt.s32.totalorder %s282_s17, %s282_s17 }
   0x7   :  { %p289_p3 = por %p288_p2, %p287_p1 }
   0x9   :  { %p290_p4 = pnand %p289_p3, %p283_p0 }
   0xb   :  { %293 = shalt.err (!%p290_p4)
}
   0xc   :  { %s341_s18 = smov 64   ;;  %s342_s19 = smov 4  }
   0xd   :  { %23 = dma.hbm_to_vmem [thread:$0]  %s397_s0, 128, %s18_s16, [#allocation5], %s341_s18, %s341_s18, %s342_s19  }
   0xe   :  { %s343_s22 = smov [#allocation7]  }
   0xf   :  { %s31_s23 = sshll.u32 %s343_s22, 4  ;;  %s32_s23 = int_to_ptr.vmem [resolvable:$true] %s31_s23 }
  0x10   :  { %s302_s24 = scalar_lea.vmem %s32_s23, 512  ;;  %p307_p6 = scmp.lt.s32.totalorder %s32_s23, %s32_s23 }
  0x11   :  { %p303_p5 = scmp.ne.s32.totalorder %s32_s23, %s302_s24  ;;  %p308_p7 = scmp.lt.s32.totalorder %s302_s24, %s302_s24 }
  0x13   :  { %p309_p8 = por %p308_p7, %p307_p6 }
  0x15   :  { %p310_p9 = pnand %p309_p8, %p303_p5 }
  0x17   :  { %313 = shalt.err (!%p310_p9)
}
  0x18   :  { %s344_s25 = smov 128   ;;  %s345_s26 = smov 8  }
  0x19   :  { %37 = dma.hbm_to_vmem [thread:$0]  %s399_s2, 512, %s32_s23, [#allocation8], %s344_s25, %s344_s25, %s345_s26  }
  0x1a   :  { %334 = dma.done.wait [#allocation5], 128  }
  0x1b   :  { %335 = vsyncadd [#allocation5], 4294967168 }
  0x1c   :  { %336 = dma.done.wait [#allocation8], 512  }
  0x1d   :  { %337 = vsyncadd [#allocation8], 4294966784  ;;  %vm52_vm0 = vcmask 1024   ;;  %v346_v0 = vmov 0.0   ;;  %v58_v1 = vld [vmem:[%s398_s1] sm:$0x1]  ;;  %v61_v4 = vlaneseq }
  0x1e   :  { %53 = vst.msk [vmem:[#allocation3] sm:$0x3] %vm52_vm0, %v346_v0  ;;  %245 = vmatprep.subr.mxu0 %v346_v0  ;;  %vm101_vm1 = vcmask 58368   ;;  %v59_v2 = vunpack.c.l.bf16 %v58_v1  ;;  %v347_v8 = vmov 0   ;;  %vm50_vm2 = vcmask 254976   ;;  %v237_v11 = vld [vmem:[#allocation4] sm:$0xff]  }
  0x1f   :  { %v62_v5 = vshrl.u32 %v61_v4, 7  ;;  %266 = vset.pattern.permute.xlu1 %v347_v8  ;;  %267 = vset.pattern.permute.xlu0 %v347_v8  ;;  %51 = vst.msk [vmem:[#allocation2] sm:$0x3] %vm50_vm2, %v346_v0  ;;  %v239_v12 = vunpack.c.h.bf16 %v237_v11  ;;  %vm77_vm3 = vcmask 261120   ;;  %v238_v21 = vunpack.c.l.bf16 %v237_v11  ;;  %v124_v28 = vld [vmem:[#allocation7 + $0x18] sm:$0xff]  ;;  %v123_v29 = vld [vmem:[#allocation7 + $0x10] sm:$0xff] }
  0x20   :  { %v102_v3 = vsel %vm101_vm1, %v59_v2, 0.0  ;;  %246 = vmatpush3.msra.mxu0 %v124_v28  ;;  %vm348_vm4 = vmmov 0   ;;  %v122_v33 = vld [vmem:[#allocation7 + $0x8] sm:$0xff]  ;;  %v121_v36 = vld [vmem:[#allocation7] sm:$0xff]  ;;  %vm94_vm5 = vcmask 1041409   ;;  %vm205_vm6 = vcmask 1041408  }
  0x21   :  { %103 = vadd.xlane.f32.xlu0 %v102_v3  ;;  %v70_v6 = vsub.s32 1, %v62_v5  ;;  %v63_v9 = vsub.s32 0, %v62_v5  ;;  %253 = vmatprep.mubr.msk.f32.mxu0 %vm348_vm4, %v346_v0  ;;  %v234_v48 = vld [vmem:[%s400_s3] ss:$0 sm:$0xff]  ;;  %s349_s30 = smov [#allocation9]  }
  0x22   :  { %247 = vmatprep.subr.mxu0 %v346_v0  ;;  %s224_s5 = sshll.u32 %s349_s30, 4  ;;  %s225_s5 = int_to_ptr.vmem [resolvable:$true] %s224_s5 }
  0x23   :  { %v71_v7 = vrot.slane %v59_v2, %v70_v6  ;;  %v64_v10 = vrot.slane %v59_v2, %v63_v9  ;;  %248 = vmatpush3.msra.mxu0 %v123_v29  ;;  %s314_s3 = scalar_lea.vmem %s225_s5, 32  ;;  %p319_p11 = scmp.lt.s32.totalorder %s225_s5, %s225_s5 }
  0x24   :  { %249 = vmatprep.subr.mxu0 %v346_v0  ;;  %p315_p10 = scmp.ne.s32.totalorder %s225_s5, %s314_s3  ;;  %p320_p12 = scmp.lt.s32.totalorder %s314_s3, %s314_s3 }
  0x25   :  { %73 = vbcast.lane.b32.xlu1 %v71_v7, 256  ;;  %v100_v17 = vld [vmem:[#allocation3] sm:$0x3]  ;;  %250 = vmatpush3.msra.mxu0 %v122_v33 }
  0x26   :  { %251 = vmatprep.subr.mxu0 %v346_v0  ;;  %v60_v40 = vld [vmem:[#allocation2] sm:$0x3]  ;;  %p321_p13 = por %p320_p12, %p319_p11 }
  0x27   :  { %252 = vmatpush3.msra.mxu0 %v121_v36 }
  0x28   :  { %p322_p0 = pnand %p321_p13, %p315_p10 }
  0x37   :  { %66 = vbcast.lane.b32.xlu0 %v64_v10, 256 }
  0x97   :  { %v74_v13 = vpop.permute.xlu1 %73 }
  0x98   :  { %v76_v14 = vmul.f32 %v239_v12, %v74_v13 }
  0x9a   :  { %v85_v15 = vsel %vm77_vm3, %v76_v14, 0.0 }
  0x9b   :  { %v86_v16 = vrot.slane %v85_v15, 4 }
  0x9d   :  { %v87_v19 = vadd.f32 %v86_v16, %v85_v15 }
  0x9f   :  { %v88_v22 = vrot.slane %v87_v19, 2 }
  0xa1   :  { %v89_v26 = vadd.f32 %v88_v22, %v87_v19 }
  0xa3   :  { %v90_v34 = vrot.slane %v89_v26, 1 }
  0xa5   :  { %v91_v38 = vadd.f32 %v90_v34, %v89_v26 }
  0xaa   :  { %v104_v18 = vpop.xlane.xlu0 %103 }
  0xab   :  { %v105_v20 = vadd.f32 %v104_v18, %v100_v17 }
  0xad   :  { %107 = vst.msk [vmem:[#allocation3] sm:$0x3] %vm52_vm0, %v105_v20 }
  0xae   :  { %v67_v23 = vpop.permute.xlu0 %66 }
  0xaf   :  { %v75_v24 = vmul.f32 %v238_v21, %v67_v23 }
  0xb1   :  { %v78_v25 = vsel %vm77_vm3, %v75_v24, 0.0 }
  0xb2   :  { %v79_v27 = vrot.slane %v78_v25, 4 }
  0xb4   :  { %v111_v30 = vld [vmem:[#allocation3] sm:$0x3]  ;;  %v80_v31 = vadd.f32 %v79_v27, %v78_v25 }
  0xb5   :  { %v112_v32 = vmax.f32 %v111_v30, 1.0 }
  0xb6   :  { %v81_v35 = vrot.slane %v80_v31, 2 }
  0xb7   :  { %116 = vperm.xlu1 %266, %v112_v32  }
  0xb8   :  { %v82_v37 = vadd.f32 %v81_v35, %v80_v31 }
  0xba   :  { %v83_v39 = vrot.slane %v82_v37, 1 }
  0xbc   :  { %v84_v41 = vadd.f32 %v83_v39, %v82_v37 }
  0xbe   :  { %v95_v42 = vsel %vm94_vm5, %v91_v38, %v84_v41 }
  0xbf   :  { %v97_v43 = vadd.f32 %v95_v42, %v60_v40 }
  0xc1   :  { %99 = vst.msk [vmem:[#allocation2] sm:$0x3] %vm50_vm2, %v97_v43 }
  0xc8   :  { %v113_v46 = vld [vmem:[#allocation2] sm:$0x3] }
 0x132   :  { %v117_v44 = vpop.permute.xlu1 %116 }
 0x133   :  { %268 = vrcp.f32 %v117_v44 }
 0x140   :  { %v269_v45 = vpop.eup %268 }
 0x141   :  { %v120_v47 = vmul.f32 %v269_v45, %v113_v46 }
 0x143   :  { %254 = vmatmul.mubr.msk.f32.vlgmr.msra.gmra.mxu0 %vm77_vm3, %v120_v47 }
 0x203   :  { %v201_v49 = vpop.f32.mrf.mxu0 }
 0x204   :  { %v202_v50 = vadd.f32 %v234_v48, %v201_v49 }
 0x205   :  { %v255_v51 = vpop.f32.mrf.mxu0 }
 0x206   :  { %v206_v52 = vsel %vm205_vm6, %v202_v50, -inf }
 0x207   :  { %207 = vmax.xlane.f32.xlu1 %v206_v52 }
 0x290   :  { %v208_v53 = vpop.xlane.xlu1 %207 }
 0x291   :  { %v209_v54 = vsub.f32 %v202_v50, %v208_v53 }
 0x293   :  { %v210_v55 = vmul.f32 1.442695, %v209_v54 }
 0x295   :  { %270 = vpow2.f32 %v210_v55 }
 0x2a2   :  { %v271_v56 = vpop.eup %270 }
 0x2a3   :  { %v212_v57 = vsel %vm205_vm6, %v271_v56, 0.0 }
 0x2a4   :  { %213 = vadd.xlane.f32.xlu0 %v212_v57 }
 0x32d   :  { %v214_v58 = vpop.xlane.xlu0 %213 }
 0x32e   :  { %272 = vrcp.f32 %v214_v58 }
 0x33b   :  { %v273_v59 = vpop.eup %272 }
 0x33c   :  { %v216_v60 = vmul.f32 %v273_v59, %v271_v56 }
 0x33e   :  { %217 = vst [vmem:[#allocation9] sm:$0x3] %v216_v60 }
 0x33f   :  { %325 = shalt.err (!%p322_p0)
}
 0x340   :  { %227 = dma.vmem_to_hbm [thread:$0]  %s225_s5, 32, %s401_s4, [#allocation6]  }
 0x341   :  { %338 = dma.done.wait [#allocation6], 32  }
 0x342   :  { %339 = vsyncadd [#allocation6], 4294967264 }
 0x343   :  { %231 = vsyncpa [#allocation5], 1 }
 0x344   :  { %232 = vsyncpa [#allocation8], 1 }
 0x345   :  { %233 = vsyncpa [#allocation6], 1 }

</bundles_post_ra>
